<compile_context>
chip_gen: v7x
topology: tpu7x:2x2x1
jax: 0.10.0
libtpu: 0.0.40
codegen_flags: <defaults>
</compile_context>

<pallas_src>
import math
from functools import partial

import jax
import jax.numpy as jnp
from jax.experimental import pallas as pl
from jax.experimental.pallas import tpu as pltpu


NEG_BIG = -1e30  # folded bias that zeroes padded class columns in the softmax


def _round_up(x, m):
    return (x + m - 1) // m * m


def _batch_tiling(B):
    # bf16 sublane packing prefers multiples of 16; 256-row tiles fill the
    # v6e/v7x MXU (128 already saturates v5e's 4x128x128 MXU, 256 is still fine).
    if B >= 256:
        tb = 256
    else:
        tb = _round_up(max(B, 16), 16)
    bp = _round_up(B, tb)
    return tb, bp


# ----------------------------------------------------------------------------
# Fused kernel: grid = (num_batch_tiles,), all ensemble members handled by a
# statically unrolled in-kernel loop over VMEM-resident weights.
# ----------------------------------------------------------------------------
def _fused_ensemble_kernel(x_ref, w1_ref, w2_ref, out_ref):
    M = w1_ref.shape[0]
    x = x_ref[...]                                            # (TB, Dp) bf16

    best_denom = None
    best_probs = None
    for m in range(M):  # M is small & static -> fully unrolled, no grid-step cost
        # layer 1 (b1 folded via the ones column in x): bf16 x bf16 -> f32 acc
        h = jnp.maximum(
            jnp.dot(x, w1_ref[m], preferred_element_type=jnp.float32), 0.0)
        # layer 2 stays on the native bf16 MXU path (b2 folded via the constant-1
        # hidden carrier channel; 1.0 is exact in bf16).
        logits = jnp.dot(h.astype(jnp.bfloat16), w2_ref[m],
                         preferred_element_type=jnp.float32)  # (TB, Cp) f32

        # softmax over the (padded, lane-dense) class dim; padded classes carry a
        # -1e30 folded bias so they contribute exactly 0 probability.
        mx = jnp.max(logits, axis=1, keepdims=True)
        e = jnp.exp(logits - mx)
        denom = jnp.sum(e, axis=1, keepdims=True)             # (TB, 1) f32
        probs = e * pl.reciprocal(denom, approx=True)         # EUP slot, ~free

        # Selection: max(probs) == exp(0)/denom == 1/denom, so "higher max-prob"
        # is simply "smaller denom".  Strict '<' keeps the earlier model on ties
        # (torch.max first-occurrence semantics).
        if m == 0:
            best_denom, best_probs = denom, probs
        else:
            take = denom < best_denom                         # (TB, 1) bool
            best_denom = jnp.where(take, denom, best_denom)
            best_probs = jnp.where(take, probs, best_probs)

    out_ref[...] = best_probs


# ----------------------------------------------------------------------------
# Weight prep: done ONCE at model-load time (hoisted out of the hot path).
# ----------------------------------------------------------------------------
def prepare_weights(w1, b1, w2, b2):
    """w1: (M, D, HID), b1: (M, 1, HID), w2: (M, HID, C), b2: (M, 1, C).
    Returns padded/folded bf16 weights (M, Dp, Hp) and (M, Hp, Cp)."""
    M, D, HID = w1.shape
    C = w2.shape[-1]

    Dp = _round_up(D + 1, 128)               # +1 ones column carrying folded b1
    Hp = _round_up(max(HID + 1, 128), 128)   # lane-dense hidden, +1 bias carrier
    Cp = _round_up(max(C, 128), 128)         # lane-dense class dim

    w1p = jnp.zeros((M, Dp, Hp), jnp.float32)
    w1p = w1p.at[:, :D, :HID].set(w1.astype(jnp.float32))
    w1p = w1p.at[:, D, :HID].set(b1[:, 0, :].astype(jnp.float32))  # fold b1
    w1p = w1p.at[:, D, HID].set(1.0)                               # carrier h[:,HID]==1
    w1p = w1p.astype(jnp.bfloat16)

    w2p = jnp.zeros((M, Hp, Cp), jnp.float32)
    w2p = w2p.at[:, :HID, :C].set(w2.astype(jnp.float32))
    w2p = w2p.at[:, HID, :C].set(b2[:, 0, :].astype(jnp.float32))  # fold b2
    w2p = w2p.at[:, HID, C:].set(NEG_BIG)                          # kill padded classes
    w2p = w2p.astype(jnp.bfloat16)
    return w1p, w2p


def _pad_input(x_nchw, Dp, Bp):
    B = x_nchw.shape[0]
    D = math.prod(x_nchw.shape[1:])
    x_flat = x_nchw.reshape(B, D).astype(jnp.float32)
    xp = jnp.zeros((Bp, Dp), jnp.float32)
    xp = xp.at[:B, :D].set(x_flat)
    xp = xp.at[:B, D].set(1.0)                                     # ones column (b1)
    return xp.astype(jnp.bfloat16)


# ----------------------------------------------------------------------------
# Hot-path forward: pad x, launch the fused kernel, slice the result.
# ----------------------------------------------------------------------------
@partial(jax.jit, static_argnames=("num_classes",))
def ensemble_max_forward(x_nchw, w1p, w2p, *, num_classes):
    """x_nchw: (B, C_in, H, W); w1p/w2p from prepare_weights.
    Returns (B, num_classes) selected softmax rows."""
    B = x_nchw.shape[0]
    M, Dp, Hp = w1p.shape
    Cp = w2p.shape[-1]
    TB, Bp = _batch_tiling(B)
    xp = _pad_input(x_nchw, Dp, Bp)

    out_padded = pl.pallas_call(
        _fused_ensemble_kernel,
        out_shape=jax.ShapeDtypeStruct((Bp, Cp), jnp.float32),
        grid_spec=pltpu.PrefetchScalarGridSpec(
            num_scalar_prefetch=0,
            grid=(Bp // TB,),
            in_specs=[
                pl.BlockSpec((TB, Dp), lambda b: (b, 0)),         # batch-tiled x
                pl.BlockSpec((M, Dp, Hp), lambda b: (0, 0, 0)),   # all w1, VMEM-resident
                pl.BlockSpec((M, Hp, Cp), lambda b: (0, 0, 0)),   # all w2, VMEM-resident
            ],
            out_specs=pl.BlockSpec((TB, Cp), lambda b: (b, 0)),
        ),
        compiler_params=pltpu.CompilerParams(
            # Pure batch-parallel grid: shards across both TCs on v7x.
            # TODO(synk): if per-member weights grow beyond a few MiB, stream
            # members as an 'arbitrary' grid axis (or K-tile w1) and set
            # vmem_limit_bytes for v7x's 64 MiB / v5e's 16 MiB scoped VMEM.
            dimension_semantics=("parallel",),
        ),
    )(xp, w1p, w2p)

    return out_padded[:B, :num_classes]


# ----------------------------------------------------------------------------
# Pure-JAX reference (mirrors the PyTorch forward), consuming the SAME padded
# bf16-quantized weights and the same bf16 h-downcast so the comparison
# isolates kernel correctness from quantization choices.
# ----------------------------------------------------------------------------
def _reference_padded(xp, w1p, w2p, B, C):
    x = xp.astype(jnp.float32)
    w1 = w1p.astype(jnp.float32)
    w2 = w2p.astype(jnp.float32)
    h = jnp.maximum(
        jnp.einsum("bd,mdh->mbh", x, w1, precision=jax.lax.Precision.HIGHEST), 0.0)
    h = h.astype(jnp.bfloat16).astype(jnp.float32)        # mirror kernel downcast
    logits = jnp.einsum("mbh,mhc->mbc", h, w2, precision=jax.lax.Precision.HIGHEST)
    probs = jax.nn.softmax(logits, axis=2)                # (M, Bp, Cp)
    x_temp = jnp.max(probs, axis=2)                       # (M, Bp)
    idx = jnp.argmax(x_temp, axis=0)                      # first occurrence, like torch.max
    sel = probs[idx, jnp.arange(xp.shape[0])]             # (Bp, Cp)
    return sel[:B, :C]


if __name__ == "__main__":
    # Small, deterministic setup: 2 ensemble members, CIFAR-ish input scaled down.
    B, C_IN, H, W = 2, 4, 16, 16
    D = C_IN * H * W
    HID = 32
    NUM_CLASSES = 10
    M = 2   # ensemble size ("nn_cifar" + "nn_mnist")

    key = jax.random.PRNGKey(0)
    kx, kw1, kb1, kw2, kb2 = jax.random.split(key, 5)

    x = jax.random.normal(kx, (B, C_IN, H, W), dtype=jnp.float32)
    w1 = jax.random.normal(kw1, (M, D, HID), dtype=jnp.float32) * 0.05
    b1 = jax.random.normal(kb1, (M, 1, HID), dtype=jnp.float32) * 0.05
    w2 = jax.random.normal(kw2, (M, HID, NUM_CLASSES), dtype=jnp.float32) * 0.05
    b2 = jax.random.normal(kb2, (M, 1, NUM_CLASSES), dtype=jnp.float32) * 0.05

    # Weight padding/folding happens once, at "model load" time (off hot path).
    w1p, w2p = prepare_weights(w1, b1, w2, b2)
    w1p, w2p = jax.block_until_ready((w1p, w2p))

    out = ensemble_max_forward(x, w1p, w2p, num_classes=NUM_CLASSES)
    out = jax.block_until_ready(out)
    assert out.shape == (B, NUM_CLASSES)

    # Reference on the same quantized weights / padding.
    _, Bp = _batch_tiling(B)
    xp = _pad_input(x, w1p.shape[1], Bp)
    ref = jax.block_until_ready(_reference_padded(xp, w1p, w2p, B, NUM_CLASSES))

    # Tolerance absorbs MXU accumulation-order and approx-reciprocal ULP diffs.
    assert jnp.allclose(out, ref, atol=2e-3, rtol=2e-3), "mismatch vs reference"

    print("KERNEL_OK")
</pallas_src>

<mosaic_0001>
module attributes {stable_mosaic.version = 11 : i64} {
  func.func @_fused_ensemble_kernel(%arg0: i32, %arg1: memref<16x1152xbf16, #tpu.memory_space<vmem>>, %arg2: memref<2x1152x128xbf16, #tpu.memory_space<vmem>>, %arg3: memref<2x128x128xbf16, #tpu.memory_space<vmem>>, %arg4: memref<16x128xf32, #tpu.memory_space<vmem>>) attributes {dimension_semantics = [#tpu.dimension_semantics<parallel>], iteration_bounds = array<i64: 1>, scalar_prefetch = 0 : i64, scratch_operands = 0 : i64, tpu.core_type = #tpu.core_type<tc>, window_params = [{transform_indices = @transform_0, window_bounds = array<i64: 16, 1152>}, {pipeline_mode = #tpu.pipeline_mode<synchronous>, transform_indices = @transform_1, window_bounds = array<i64: 2, 1152, 128>}, {pipeline_mode = #tpu.pipeline_mode<synchronous>, transform_indices = @transform_2, window_bounds = array<i64: 2, 128, 128>}, {transform_indices = @transform_3, window_bounds = array<i64: 16, 128>}]} {
    %c0 = arith.constant 0 : index
    %c0_0 = arith.constant 0 : index
    %0 = vector.load %arg1[%c0, %c0_0] : memref<16x1152xbf16, #tpu.memory_space<vmem>>, vector<16x1152xbf16>
    %c0_1 = arith.constant 0 : index
    %c0_2 = arith.constant 0 : index
    %c0_3 = arith.constant 0 : index
    %1 = vector.load %arg2[%c0_1, %c0_2, %c0_3] : memref<2x1152x128xbf16, #tpu.memory_space<vmem>>, vector<1x1152x128xbf16>
    %2 = vector.shape_cast %1 : vector<1x1152x128xbf16> to vector<1152x128xbf16>
    %cst = arith.constant dense<0.000000e+00> : vector<16x128xf32>
    %3 = tpu.matmul %0, %2, %cst {dimension_numbers = #tpu.dot_dimension_numbers<[1], [0], [0], [1], [0, 0, 1, 1], [], []>} : vector<16x1152xbf16>, vector<1152x128xbf16>, vector<16x128xf32> -> vector<16x128xf32>
    %cst_4 = arith.constant 0.000000e+00 : f32
    %4 = vector.broadcast %cst_4 : f32 to vector<16x128xf32>
    %5 = arith.maximumf %3, %4 : vector<16x128xf32>
    %6 = arith.truncf %5 : vector<16x128xf32> to vector<16x128xbf16>
    %c0_5 = arith.constant 0 : index
    %c0_6 = arith.constant 0 : index
    %c0_7 = arith.constant 0 : index
    %7 = vector.load %arg3[%c0_5, %c0_6, %c0_7] : memref<2x128x128xbf16, #tpu.memory_space<vmem>>, vector<1x128x128xbf16>
    %8 = vector.shape_cast %7 : vector<1x128x128xbf16> to vector<128x128xbf16>
    %cst_8 = arith.constant dense<0.000000e+00> : vector<16x128xf32>
    %9 = tpu.matmul %6, %8, %cst_8 {dimension_numbers = #tpu.dot_dimension_numbers<[1], [0], [0], [1], [0, 0, 1, 1], [], []>} : vector<16x128xbf16>, vector<128x128xbf16>, vector<16x128xf32> -> vector<16x128xf32>
    %cst_9 = arith.constant dense<0xFF800000> : vector<16xf32>
    %10 = vector.multi_reduction <maximumf>, %9, %cst_9 [1] : vector<16x128xf32> to vector<16xf32>
    %11 = vector.shape_cast %10 : vector<16xf32> to vector<16x1xf32>
    %12 = vector.broadcast %11 : vector<16x1xf32> to vector<16x128xf32>
    %13 = arith.subf %9, %12 : vector<16x128xf32>
    %14 = math.exp %13 : vector<16x128xf32>
    %cst_10 = arith.constant dense<0.000000e+00> : vector<16xf32>
    %15 = vector.multi_reduction <add>, %14, %cst_10 [1] : vector<16x128xf32> to vector<16xf32>
    %16 = vector.shape_cast %15 : vector<16xf32> to vector<16x1xf32>
    %17 = tpu.reciprocal %16 {approx = true} : vector<16x1xf32> -> vector<16x1xf32>
    %18 = vector.broadcast %17 : vector<16x1xf32> to vector<16x128xf32>
    %19 = arith.mulf %14, %18 : vector<16x128xf32>
    %c1 = arith.constant 1 : index
    %c0_11 = arith.constant 0 : index
    %c0_12 = arith.constant 0 : index
    %20 = vector.load %arg2[%c1, %c0_11, %c0_12] : memref<2x1152x128xbf16, #tpu.memory_space<vmem>>, vector<1x1152x128xbf16>
    %21 = vector.shape_cast %20 : vector<1x1152x128xbf16> to vector<1152x128xbf16>
    %cst_13 = arith.constant dense<0.000000e+00> : vector<16x128xf32>
    %22 = tpu.matmul %0, %21, %cst_13 {dimension_numbers = #tpu.dot_dimension_numbers<[1], [0], [0], [1], [0, 0, 1, 1], [], []>} : vector<16x1152xbf16>, vector<1152x128xbf16>, vector<16x128xf32> -> vector<16x128xf32>
    %cst_14 = arith.constant 0.000000e+00 : f32
    %23 = vector.broadcast %cst_14 : f32 to vector<16x128xf32>
    %24 = arith.maximumf %22, %23 : vector<16x128xf32>
    %25 = arith.truncf %24 : vector<16x128xf32> to vector<16x128xbf16>
    %c1_15 = arith.constant 1 : index
    %c0_16 = arith.constant 0 : index
    %c0_17 = arith.constant 0 : index
    %26 = vector.load %arg3[%c1_15, %c0_16, %c0_17] : memref<2x128x128xbf16, #tpu.memory_space<vmem>>, vector<1x128x128xbf16>
    %27 = vector.shape_cast %26 : vector<1x128x128xbf16> to vector<128x128xbf16>
    %cst_18 = arith.constant dense<0.000000e+00> : vector<16x128xf32>
    %28 = tpu.matmul %25, %27, %cst_18 {dimension_numbers = #tpu.dot_dimension_numbers<[1], [0], [0], [1], [0, 0, 1, 1], [], []>} : vector<16x128xbf16>, vector<128x128xbf16>, vector<16x128xf32> -> vector<16x128xf32>
    %cst_19 = arith.constant dense<0xFF800000> : vector<16xf32>
    %29 = vector.multi_reduction <maximumf>, %28, %cst_19 [1] : vector<16x128xf32> to vector<16xf32>
    %30 = vector.shape_cast %29 : vector<16xf32> to vector<16x1xf32>
    %31 = vector.broadcast %30 : vector<16x1xf32> to vector<16x128xf32>
    %32 = arith.subf %28, %31 : vector<16x128xf32>
    %33 = math.exp %32 : vector<16x128xf32>
    %cst_20 = arith.constant dense<0.000000e+00> : vector<16xf32>
    %34 = vector.multi_reduction <add>, %33, %cst_20 [1] : vector<16x128xf32> to vector<16xf32>
    %35 = vector.shape_cast %34 : vector<16xf32> to vector<16x1xf32>
    %36 = tpu.reciprocal %35 {approx = true} : vector<16x1xf32> -> vector<16x1xf32>
    %37 = vector.broadcast %36 : vector<16x1xf32> to vector<16x128xf32>
    %38 = arith.mulf %33, %37 : vector<16x128xf32>
    %39 = arith.cmpf olt, %35, %16 : vector<16x1xf32>
    %40 = vector.shape_cast %39 : vector<16x1xi1> to vector<16x1xi1>
    %41 = vector.broadcast %40 : vector<16x1xi1> to vector<16x128xi1>
    %42 = arith.select %41, %38, %19 : vector<16x128xi1>, vector<16x128xf32>
    %c0_21 = arith.constant 0 : index
    %c0_22 = arith.constant 0 : index
    %43 = vector.load %arg4[%c0_21, %c0_22] : memref<16x128xf32, #tpu.memory_space<vmem>>, vector<16x128xf32>
    tpu.vector_store %arg4[%c0_21, %c0_22], %42 {strides = array<i32>} : memref<16x128xf32, #tpu.memory_space<vmem>>, vector<16x128xf32>,
    return
  }
  func.func @transform_0(%arg0: i32) -> (i32, i32) {
    %c0_i32 = arith.constant 0 : i32
    %c0_i32_0 = arith.constant 0 : i32
    return %arg0, %c0_i32 : i32, i32
  }
  func.func @transform_1(%arg0: i32) -> (i32, i32, i32) {
    %c0_i32 = arith.constant 0 : i32
    %c0_i32_0 = arith.constant 0 : i32
    %c0_i32_1 = arith.constant 0 : i32
    %c0_i32_2 = arith.constant 0 : i32
    return %c0_i32, %c0_i32_0, %c0_i32_1 : i32, i32, i32
  }
  func.func @transform_2(%arg0: i32) -> (i32, i32, i32) {
    %c0_i32 = arith.constant 0 : i32
    %c0_i32_0 = arith.constant 0 : i32
    %c0_i32_1 = arith.constant 0 : i32
    %c0_i32_2 = arith.constant 0 : i32
    return %c0_i32, %c0_i32_0, %c0_i32_1 : i32, i32, i32
  }
  func.func @transform_3(%arg0: i32) -> (i32, i32) {
    %c0_i32 = arith.constant 0 : i32
    %c0_i32_0 = arith.constant 0 : i32
    return %arg0, %c0_i32 : i32, i32
  }
}

</mosaic_0001>

<bundles_post_ra>
// kernel: ensemble_max_forward.1
= control target key start
LH: loop header
LB: loop body
LE: loop exit
PB: predicated region body
PF: predicated region fallthrough
CT: control target
= control target key end

     0   :  { %8 = vsyncpa [#allocation3], 0  ;;  %s2613_s12 = smov [#allocation2]   ;;  %s2805_s0 = inlined_call_operand.vmem [shape: bf16[16,1152], index: 0, kind: input, shape index: {}]   ;;  %s2806_s1 = inlined_call_operand.hbm [shape: bf16[2,1152,128], index: 1, kind: input, shape index: {}]   ;;  %s2807_s2 = inlined_call_operand.vmem [shape: bf16[2,128,128], index: 2, kind: input, shape index: {}]   ;;  %s2808_s3 = inlined_call_operand.vmem [shape: f32[16,128], index: 3, kind: output, shape index: {}]  }
   0x1   :  { %s16_s13 = sshll.u32 %s2613_s12, 4  ;;  %s2589_s16 = scalar_lea.hbm %s2806_s1, 18432  ;;  %s17_s13 = int_to_ptr.vmem [resolvable:$true] %s16_s13 }
   0x2   :  { %p2590_p0 = scmp.ne.s32.totalorder %s2806_s1, %s2589_s16  ;;  %p2593_p1 = scmp.lt.u32.totalorder %s2589_s16, %s2806_s1 }
   0x4   :  { %p2595_p2 = pnand %p2593_p1, %p2590_p0 }
   0x6   :  { %2598 = shalt.err (!%p2595_p2)
}
   0x7   :  { %s2599_s21 = scalar_lea.vmem %s17_s13, 18432  ;;  %p2604_p4 = scmp.lt.s32.totalorder %s17_s13, %s17_s13 }
   0x8   :  { %p2600_p3 = scmp.ne.s32.totalorder %s17_s13, %s2599_s21  ;;  %p2605_p5 = scmp.lt.s32.totalorder %s2599_s21, %s2599_s21 }
   0xa   :  { %p2606_p6 = por %p2605_p5, %p2604_p4 }
   0xc   :  { %p2607_p7 = pnand %p2606_p6, %p2600_p3 }
   0xe   :  { %2610 = shalt.err (!%p2607_p7)
}
   0xf   :  { %s2614_s22 = smov 64   ;;  %s2615_s23 = smov 4  }
  0x10   :  { %22 = dma.hbm_to_vmem [thread:$0]  %s2806_s1, 18432, %s17_s13, [#allocation3], %s2614_s22, %s2614_s22, %s2615_s23  }
  0x11   :  { %2611 = dma.done.wait [#allocation3], 18432  }
  0x12   :  { %2612 = vsyncadd [#allocation3], 4294948864  ;;  %v2398_v0 = vld [vmem:[#allocation2 + $0x40] sm:$0xff]   ;;  %v2402_v4 = vld [vmem:[#allocation2 + $0x48] sm:$0xff]   ;;  %vm2617_vm0 = vmmov 0  }
  0x13   :  { %v2399_v1 = vld [vmem:[#allocation2 + $0xc0] sm:$0xff]   ;;  %2101 = vmatprep.subr.bf16.mxu0 %v2398_v0  ;;  %v2403_v5 = vld [vmem:[#allocation2 + $0xc8] sm:$0xff]   ;;  %v2406_v8 = vld [vmem:[#allocation2 + $0x50] sm:$0xff]  }
  0x14   :  { %v2400_v2 = vld [vmem:[#allocation2] sm:$0xff]   ;;  %2123 = vmatprep.subr.bf16.mxu1 %v2399_v1  ;;  %v2404_v6 = vld [vmem:[#allocation2 + $0x8] sm:$0xff]   ;;  %v2407_v9 = vld [vmem:[#allocation2 + $0xd0] sm:$0xff]  }
  0x15   :  { %v2401_v3 = vld [vmem:[#allocation2 + $0x80] sm:$0xff]   ;;  %2102 = vmatpush3.bf16.msra.mxu0 %v2400_v2  ;;  %v2405_v7 = vld [vmem:[#allocation2 + $0x88] sm:$0xff]   ;;  %v2408_v10 = vld [vmem:[#allocation2 + $0x10] sm:$0xff]  }
  0x16   :  { %2124 = vmatpush3.bf16.msra.mxu1 %v2401_v3  ;;  %2103 = vmatprep.subr.bf16.mxu0 %v2402_v4  ;;  %v2409_v11 = vld [vmem:[#allocation2 + $0x90] sm:$0xff]   ;;  %v2410_v12 = vld [vmem:[#allocation2 + $0x58] sm:$0xff]   ;;  %v2414_v16 = vld [vmem:[#allocation2 + $0x60] sm:$0xff]  }
  0x17   :  { %2125 = vmatprep.subr.bf16.mxu1 %v2403_v5  ;;  %v2411_v13 = vld [vmem:[#allocation2 + $0xd8] sm:$0xff]   ;;  %v2415_v17 = vld [vmem:[#allocation2 + $0xe0] sm:$0xff]   ;;  %v2418_v20 = vld [vmem:[#allocation2 + $0x68] sm:$0xff]  }
  0x18   :  { %v2412_v14 = vld [vmem:[#allocation2 + $0x18] sm:$0xff]   ;;  %v2416_v18 = vld [vmem:[#allocation2 + $0x20] sm:$0xff]   ;;  %v2419_v21 = vld [vmem:[#allocation2 + $0xe8] sm:$0xff]  }
  0x19   :  { %2104 = vmatpush3.bf16.msra.mxu0 %v2404_v6  ;;  %v2413_v15 = vld [vmem:[#allocation2 + $0x98] sm:$0xff]   ;;  %v2417_v19 = vld [vmem:[#allocation2 + $0xa0] sm:$0xff]   ;;  %v2420_v22 = vld [vmem:[#allocation2 + $0x28] sm:$0xff]   ;;  %v2616_v6 = vmov 0.0  }
  0x1a   :  { %2126 = vmatpush3.bf16.msra.mxu1 %v2405_v7  ;;  %2105 = vmatprep.subr.bf16.mxu0 %v2406_v8  ;;  %v2421_v23 = vld [vmem:[#allocation2 + $0xa8] sm:$0xff]   ;;  %v2422_v24 = vld [vmem:[#allocation2 + $0x70] sm:$0xff]   ;;  %v2426_v28 = vld [vmem:[#allocation2 + $0x78] sm:$0xff]  }
  0x1b   :  { %2127 = vmatprep.subr.bf16.mxu1 %v2407_v9  ;;  %v2423_v25 = vld [vmem:[#allocation2 + $0xf0] sm:$0xff]   ;;  %v2427_v29 = vld [vmem:[#allocation2 + $0xf8] sm:$0xff]   ;;  %v2653_v32 = vld [vmem:[%s2805_s0] ss:$36 sps:$4 sm:$0xff]  }
  0x1c   :  { %v2424_v26 = vld [vmem:[#allocation2 + $0x30] sm:$0xff]   ;;  %v2428_v30 = vld [vmem:[#allocation2 + $0x38] sm:$0xff]   ;;  %v2658_v33 = vld [vmem:[%s2805_s0 + $0x4] ss:$36 sps:$4 sm:$0xff]  }
  0x1d   :  { %2106 = vmatpush3.bf16.msra.mxu0 %v2408_v10  ;;  %v2425_v27 = vld [vmem:[#allocation2 + $0xb0] sm:$0xff]   ;;  %v2429_v31 = vld [vmem:[#allocation2 + $0xb8] sm:$0xff]   ;;  %v2433_v34 = vld [vmem:[%s2805_s0 + $0x8] ss:$36 sps:$4 sm:$0xff]   ;;  %693 = vmatprep.mubr.bf16.mxu0 %v2658_v33 }
  0x1e   :  { %2128 = vmatpush3.bf16.msra.mxu1 %v2409_v11  ;;  %2107 = vmatprep.subr.bf16.mxu0 %v2410_v12  ;;  %v2435_v35 = vld [vmem:[%s2805_s0 + $0xc] ss:$36 sps:$4 sm:$0xff]   ;;  %v2436_v36 = vld [vmem:[#allocation2 + $0x140] sm:$0xff]   ;;  %v2448_v48 = vld [vmem:[#allocation2 + $0x158] sm:$0xff]  }
  0x1f   :  { %2129 = vmatprep.subr.bf16.mxu1 %v2411_v13  ;;  %734 = vmatprep.mubr.bf16.mxu1 %v2435_v35  ;;  %v2437_v37 = vld [vmem:[#allocation2 + $0x100] sm:$0xff]   ;;  %v2440_v40 = vld [vmem:[#allocation2 + $0x148] sm:$0xff]   ;;  %v2444_v44 = vld [vmem:[#allocation2 + $0x150] sm:$0xff]  }
  0x20   :  { %v2438_v38 = vld [vmem:[#allocation2 + $0x1c0] sm:$0xff]   ;;  %v2441_v41 = vld [vmem:[#allocation2 + $0x108] sm:$0xff]   ;;  %v2445_v45 = vld [vmem:[#allocation2 + $0x110] sm:$0xff]  }
  0x21   :  { %2108 = vmatpush3.bf16.msra.mxu0 %v2412_v14  ;;  %v2439_v39 = vld [vmem:[#allocation2 + $0x180] sm:$0xff]   ;;  %v2442_v42 = vld [vmem:[#allocation2 + $0x1c8] sm:$0xff]   ;;  %v2446_v46 = vld [vmem:[#allocation2 + $0x1d0] sm:$0xff]  }
  0x22   :  { %2130 = vmatpush3.bf16.msra.mxu1 %v2413_v15  ;;  %2109 = vmatprep.subr.bf16.mxu0 %v2414_v16  ;;  %v2443_v43 = vld [vmem:[#allocation2 + $0x188] sm:$0xff]   ;;  %v2447_v47 = vld [vmem:[#allocation2 + $0x190] sm:$0xff]   ;;  %v2449_v49 = vld [vmem:[#allocation2 + $0x118] sm:$0xff]  }
  0x23   :  { %2131 = vmatprep.subr.bf16.mxu1 %v2415_v17  ;;  %v2450_v50 = vld [vmem:[#allocation2 + $0x1d8] sm:$0xff]   ;;  %v2452_v52 = vld [vmem:[#allocation2 + $0x160] sm:$0xff]   ;;  %v2456_v56 = vld [vmem:[#allocation2 + $0x168] sm:$0xff]  }
  0x24   :  { %v2451_v51 = vld [vmem:[#allocation2 + $0x198] sm:$0xff]   ;;  %v2453_v53 = vld [vmem:[#allocation2 + $0x120] sm:$0xff]   ;;  %v2457_v57 = vld [vmem:[#allocation2 + $0x128] sm:$0xff]  }
  0x25   :  { %2110 = vmatpush3.bf16.msra.mxu0 %v2416_v18  ;;  %v2454_v54 = vld [vmem:[#allocation2 + $0x1e0] sm:$0xff]   ;;  %v2458_v58 = vld [vmem:[#allocation2 + $0x1e8] sm:$0xff]   ;;  %v2460_v60 = vld [vmem:[#allocation2 + $0x170] sm:$0xff]  }
  0x26   :  { %2132 = vmatpush3.bf16.msra.mxu1 %v2417_v19  ;;  %2111 = vmatprep.subr.bf16.mxu0 %v2418_v20  ;;  %v2455_v55 = vld [vmem:[#allocation2 + $0x1a0] sm:$0xff]   ;;  %v2459_v59 = vld [vmem:[#allocation2 + $0x1a8] sm:$0xff]   ;;  %v2461_v61 = vld [vmem:[#allocation2 + $0x130] sm:$0xff]  }
  0x27   :  { %2133 = vmatprep.subr.bf16.mxu1 %v2419_v21  ;;  %v2462_v62 = vld [vmem:[#allocation2 + $0x1f0] sm:$0xff]   ;;  %v2464_v0 = vld [vmem:[#allocation2 + $0x178] sm:$0xff]   ;;  %v2474_v9 = vld [vmem:[#allocation2 + $0x200] sm:$0xff]  }
  0x28   :  { %v2463_v63 = vld [vmem:[#allocation2 + $0x1b0] sm:$0xff]   ;;  %v2465_v1 = vld [vmem:[#allocation2 + $0x138] sm:$0xff]   ;;  %v2475_v10 = vld [vmem:[#allocation2 + $0x208] sm:$0xff]  }
  0x29   :  { %2112 = vmatpush3.bf16.msra.mxu0 %v2420_v22  ;;  %v2466_v2 = vld [vmem:[#allocation2 + $0x1f8] sm:$0xff]   ;;  %v2671_v3 = vld [vmem:[%s2805_s0 + $0x10] ss:$36 sps:$4 sm:$0xff]   ;;  %v2478_v13 = vld [vmem:[#allocation2 + $0x220] sm:$0xff]  }
  0x2a   :  { %2134 = vmatpush3.bf16.msra.mxu1 %v2421_v23  ;;  %2113 = vmatprep.subr.bf16.mxu0 %v2422_v24  ;;  %v2676_v4 = vld [vmem:[%s2805_s0 + $0x14] ss:$36 sps:$4 sm:$0xff]   ;;  %v2689_v8 = vld [vmem:[%s2805_s0 + $0x1c] ss:$36 sps:$4 sm:$0xff]   ;;  %v2479_v14 = vld [vmem:[#allocation2 + $0x228] sm:$0xff]  }
  0x2b   :  { %2135 = vmatprep.subr.bf16.mxu1 %v2423_v25  ;;  %v2470_v5 = vld [vmem:[#allocation2 + $0x1b8] sm:$0xff]   ;;  %v2476_v11 = vld [vmem:[#allocation2 + $0x210] sm:$0xff]   ;;  %v2708_v17 = vld [vmem:[%s2805_s0 + $0x20] ss:$36 sps:$4 sm:$0xff]  }
  0x2c   :  { %v2683_v7 = vld [vmem:[%s2805_s0 + $0x18] ss:$36 sps:$4 sm:$0xff]   ;;  %v2480_v15 = vld [vmem:[#allocation2 + $0x230] sm:$0xff]   ;;  %v2483_v18 = vld [vmem:[%s2807_s2] sm:$0xff]  }
  0x2d   :  { %2114 = vmatpush3.bf16.msra.mxu0 %v2424_v26  ;;  %v2477_v12 = vld [vmem:[#allocation2 + $0x218] sm:$0xff]   ;;  %v2484_v19 = vld [vmem:[#allocation2 + $0x280] sm:$0xff]   ;;  %v2487_v21 = vld [vmem:[#allocation2 + $0x288] sm:$0xff]  }
  0x2e   :  { %2136 = vmatpush3.bf16.msra.mxu1 %v2425_v27  ;;  %2115 = vmatprep.subr.bf16.mxu0 %v2426_v28  ;;  %v2481_v16 = vld [vmem:[#allocation2 + $0x238] sm:$0xff]   ;;  %v2485_v20 = vld [vmem:[#allocation2 + $0x240] sm:$0xff]   ;;  %v2486_v22 = vld [vmem:[%s2807_s2 + $0x8] sm:$0xff]  }
  0x2f   :  { %2137 = vmatprep.subr.bf16.mxu1 %v2427_v29  ;;  %v2488_v23 = vld [vmem:[#allocation2 + $0x248] sm:$0xff]   ;;  %v2490_v24 = vld [vmem:[#allocation2 + $0x290] sm:$0xff]   ;;  %v2493_v27 = vld [vmem:[#allocation2 + $0x298] sm:$0xff]  }
  0x30   :  { %v2489_v25 = vld [vmem:[%s2807_s2 + $0x10] sm:$0xff]   ;;  %v2492_v28 = vld [vmem:[%s2807_s2 + $0x18] sm:$0xff]   ;;  %v2498_v35 = vld [vmem:[%s2807_s2 + $0x28] sm:$0xff]  }
  0x31   :  { %2116 = vmatpush3.bf16.msra.mxu0 %v2428_v30  ;;  %v2491_v26 = vld [vmem:[#allocation2 + $0x250] sm:$0xff]   ;;  %v2494_v29 = vld [vmem:[#allocation2 + $0x258] sm:$0xff]   ;;  %v2496_v30 = vld [vmem:[#allocation2 + $0x2a0] sm:$0xff]  }
  0x32   :  { %2138 = vmatpush3.bf16.msra.mxu1 %v2429_v31  ;;  %2145 = vmatprep.subr.bf16.mxu0 %v2436_v36  ;;  %v2495_v31 = vld [vmem:[%s2807_s2 + $0x20] sm:$0xff]   ;;  %v2500_v36 = vld [vmem:[#allocation2 + $0x268] sm:$0xff]  }
  0x33   :  { %2167 = vmatprep.subr.bf16.mxu1 %v2438_v38  ;;  %v2502_v38 = vld [vmem:[#allocation2 + $0x2b0] sm:$0xff]  }
  0x34   :  { %694 = vmatmul.mubr.bf16.vlgmr.msra.gmra.mrb[0].mxu0 %v2653_v32 }
  0x35   :  { %735 = vmatmul.mubr.bf16.vlgmr.msra.gmra.mrb[0].mxu1 %v2433_v34  ;;  %2146 = vmatpush3.bf16.msra.mxu0 %v2437_v37  ;;  %v2499_v34 = vld [vmem:[#allocation2 + $0x2a8] sm:$0xff]   ;;  %v2501_v37 = vld [vmem:[%s2807_s2 + $0x30] sm:$0xff]  }
  0x36   :  { %2168 = vmatpush3.bf16.msra.mxu1 %v2439_v39  ;;  %2147 = vmatprep.subr.bf16.mxu0 %v2440_v40  ;;  %v2503_v39 = vld [vmem:[#allocation2 + $0x270] sm:$0xff]   ;;  %v2504_v40 = vld [vmem:[%s2807_s2 + $0x38] sm:$0xff]  }
  0x37   :  { %2169 = vmatprep.subr.bf16.mxu1 %v2442_v42  ;;  %775 = vmatprep.mubr.bf16.mxu0 %v2676_v4  ;;  %v2506_v42 = vld [vmem:[#allocation2 + $0x278] sm:$0xff]  }
  0x38   :  { %816 = vmatprep.mubr.bf16.mxu1 %v2689_v8 }
  0x39   :  { %2148 = vmatpush3.bf16.msra.mxu0 %v2441_v41  ;;  %v2505_v41 = vld [vmem:[#allocation2 + $0x2b8] sm:$0xff]  }
  0x3a   :  { %2170 = vmatpush3.bf16.msra.mxu1 %v2443_v43  ;;  %2149 = vmatprep.subr.bf16.mxu0 %v2444_v44  ;;  %v2507_v43 = vld [vmem:[#allocation2 + $0x300] sm:$0xff]  }
  0x3b   :  { %2171 = vmatprep.subr.bf16.mxu1 %v2446_v46  ;;  %v2509_v44 = vld [vmem:[#allocation2 + $0x380] sm:$0xff]   ;;  %v2513_v46 = vld [vmem:[#allocation2 + $0x388] sm:$0xff]  }
  0x3d   :  { %2150 = vmatpush3.bf16.msra.mxu0 %v2445_v45  ;;  %v2510_v45 = vld [vmem:[#allocation2 + $0x340] sm:$0xff]  }
  0x3e   :  { %2172 = vmatpush3.bf16.msra.mxu1 %v2447_v47  ;;  %2151 = vmatprep.subr.bf16.mxu0 %v2448_v48  ;;  %v2514_v47 = vld [vmem:[#allocation2 + $0x348] sm:$0xff]   ;;  %v2517_v48 = vld [vmem:[#allocation2 + $0x390] sm:$0xff]  }
  0x3f   :  { %2173 = vmatprep.subr.bf16.mxu1 %v2450_v50  ;;  %v2521_v50 = vld [vmem:[#allocation2 + $0x398] sm:$0xff]  }
  0x41   :  { %2152 = vmatpush3.bf16.msra.mxu0 %v2449_v49  ;;  %v2518_v49 = vld [vmem:[#allocation2 + $0x350] sm:$0xff]  }
  0x42   :  { %2174 = vmatpush3.bf16.msra.mxu1 %v2451_v51  ;;  %2153 = vmatprep.subr.bf16.mxu0 %v2452_v52  ;;  %v2522_v51 = vld [vmem:[#allocation2 + $0x358] sm:$0xff]   ;;  %v2525_v52 = vld [vmem:[#allocation2 + $0x3a0] sm:$0xff]  }
  0x43   :  { %2175 = vmatprep.subr.bf16.mxu1 %v2454_v54  ;;  %v2530_v54 = vld [vmem:[#allocation2 + $0x368] sm:$0xff]  }
  0x45   :  { %2154 = vmatpush3.bf16.msra.mxu0 %v2453_v53  ;;  %v2526_v53 = vld [vmem:[#allocation2 + $0x360] sm:$0xff]  }
  0x46   :  { %2176 = vmatpush3.bf16.msra.mxu1 %v2455_v55  ;;  %2155 = vmatprep.subr.bf16.mxu0 %v2456_v56  ;;  %v2533_v55 = vld [vmem:[#allocation2 + $0x3b0] sm:$0xff]  }
  0x47   :  { %2177 = vmatprep.subr.bf16.mxu1 %v2458_v58  ;;  %v2534_v56 = vld [vmem:[#allocation2 + $0x370] sm:$0xff]   ;;  %v2538_v58 = vld [vmem:[#allocation2 + $0x378] sm:$0xff]  }
  0x49   :  { %2156 = vmatpush3.bf16.msra.mxu0 %v2457_v57  ;;  %v2537_v57 = vld [vmem:[#allocation2 + $0x3b8] sm:$0xff]  }
  0x4a   :  { %2178 = vmatpush3.bf16.msra.mxu1 %v2459_v59  ;;  %2157 = vmatprep.subr.bf16.mxu0 %v2460_v60  ;;  %v2541_v59 = vld [vmem:[#allocation2 + $0x440] sm:$0xff]   ;;  %v2544_v60 = vld [vmem:[#allocation2 + $0x448] sm:$0xff]  }
  0x4b   :  { %2179 = vmatprep.subr.bf16.mxu1 %v2462_v62  ;;  %v2550_v62 = vld [vmem:[#allocation2 + $0x458] sm:$0xff]  }
  0x4d   :  { %2158 = vmatpush3.bf16.msra.mxu0 %v2461_v61  ;;  %v2547_v61 = vld [vmem:[#allocation2 + $0x450] sm:$0xff]  }
  0x4e   :  { %2180 = vmatpush3.bf16.msra.mxu1 %v2463_v63  ;;  %2159 = vmatprep.subr.bf16.mxu0 %v2464_v0  ;;  %v2553_v63 = vld [vmem:[#allocation2 + $0x460] sm:$0xff]  }
  0x4f   :  { %2181 = vmatprep.subr.bf16.mxu1 %v2466_v2 }
  0x51   :  { %2160 = vmatpush3.bf16.msra.mxu0 %v2465_v1 }
  0x52   :  { %2313 = vmatprep.subr.bf16.mxu0 %v2616_v6  ;;  %2182 = vmatpush3.bf16.msra.mxu1 %v2470_v5 }
  0x53   :  { %2333 = vmatprep.subr.bf16.mxu1 %v2616_v6 }
  0x54   :  { %776 = vmatmul.mubr.bf16.vlgmr.msra.gmra.mrb[4].mxu0 %v2671_v3 }
  0x55   :  { %2329 = vmatprep.mubr.msk.bf16.mxu0 %vm2617_vm0, %v2616_v6  ;;  %2314 = vmatpush3.bf16.msra.mxu0 %v2474_v9 }
  0x56   :  { %817 = vmatmul.mubr.bf16.vlgmr.msra.gmra.mrb[4].mxu1 %v2683_v7  ;;  %2315 = vmatprep.subr.bf16.mxu0 %v2616_v6 }
  0x57   :  { %2349 = vmatprep.mubr.msk.bf16.mxu1 %vm2617_vm0, %v2616_v6  ;;  %2334 = vmatpush3.bf16.msra.mxu1 %v2483_v18  ;;  %v2559_v18 = vld [vmem:[#allocation2 + $0x470] sm:$0xff]  }
  0x58   :  { %2335 = vmatprep.subr.bf16.mxu1 %v2616_v6 }
  0x59   :  { %2316 = vmatpush3.bf16.msra.mxu0 %v2475_v10 }
  0x5a   :  { %2317 = vmatprep.subr.bf16.mxu0 %v2616_v6 }
  0x5b   :  { %2336 = vmatpush3.bf16.msra.mxu1 %v2486_v22 }
  0x5c   :  { %2337 = vmatprep.subr.bf16.mxu1 %v2616_v6 }
  0x5d   :  { %2318 = vmatpush3.bf16.msra.mxu0 %v2476_v11 }
  0x5e   :  { %2319 = vmatprep.subr.bf16.mxu0 %v2616_v6 }
  0x5f   :  { %2338 = vmatpush3.bf16.msra.mxu1 %v2489_v25 }
  0x60   :  { %2339 = vmatprep.subr.bf16.mxu1 %v2616_v6 }
  0x61   :  { %2320 = vmatpush3.bf16.msra.mxu0 %v2477_v12 }
  0x62   :  { %2321 = vmatprep.subr.bf16.mxu0 %v2616_v6 }
  0x63   :  { %2340 = vmatpush3.bf16.msra.mxu1 %v2492_v28 }
  0x64   :  { %2341 = vmatprep.subr.bf16.mxu1 %v2616_v6 }
  0x65   :  { %2322 = vmatpush3.bf16.msra.mxu0 %v2478_v13 }
  0x66   :  { %2323 = vmatprep.subr.bf16.mxu0 %v2616_v6 }
  0x67   :  { %2342 = vmatpush3.bf16.msra.mxu1 %v2495_v31 }
  0x68   :  { %2343 = vmatprep.subr.bf16.mxu1 %v2616_v6 }
  0x69   :  { %2324 = vmatpush3.bf16.msra.mxu0 %v2479_v14 }
  0x6a   :  { %2325 = vmatprep.subr.bf16.mxu0 %v2616_v6 }
  0x6b   :  { %2344 = vmatpush3.bf16.msra.mxu1 %v2498_v35 }
  0x6c   :  { %2345 = vmatprep.subr.bf16.mxu1 %v2616_v6 }
  0x6d   :  { %2326 = vmatpush3.bf16.msra.mxu0 %v2480_v15 }
  0x6e   :  { %2327 = vmatprep.subr.bf16.mxu0 %v2616_v6 }
  0x6f   :  { %2346 = vmatpush3.bf16.msra.mxu1 %v2501_v37 }
  0x70   :  { %2347 = vmatprep.subr.bf16.mxu1 %v2616_v6 }
  0x71   :  { %2328 = vmatpush3.bf16.msra.mxu0 %v2481_v16 }
  0x72   :  { %2207 = vmatprep.subr.bf16.mxu0 %v2484_v19 }
  0x73   :  { %2348 = vmatpush3.bf16.msra.mxu1 %v2504_v40 }
  0x74   :  { %2330 = vmatmul.mubr.bf16.vlgmr.msra.gmra.mrb[8].mxu0 %v2708_v17  ;;  %2229 = vmatprep.subr.bf16.mxu1 %v2507_v43 }
  0x75   :  { %1601 = vmatprep.mubr.bf16.mxu0 %v2658_v33  ;;  %2208 = vmatpush3.bf16.msra.mxu0 %v2485_v20  ;;  %v2497_v33 = vld [vmem:[#allocation2 + $0x260] sm:$0xff]   ;;  %v2562_v20 = vld [vmem:[#allocation2 + $0x478] sm:$0xff]  }
  0x76   :  { %2209 = vmatprep.subr.bf16.mxu0 %v2487_v21 }
  0x79   :  { %2210 = vmatpush3.bf16.msra.mxu0 %v2488_v23 }
  0x7a   :  { %2211 = vmatprep.subr.bf16.mxu0 %v2490_v24 }
  0x7d   :  { %2212 = vmatpush3.bf16.msra.mxu0 %v2491_v26 }
  0x7e   :  { %2213 = vmatprep.subr.bf16.mxu0 %v2493_v27 }
  0x81   :  { %2214 = vmatpush3.bf16.msra.mxu0 %v2494_v29 }
  0x82   :  { %2215 = vmatprep.subr.bf16.mxu0 %v2496_v30 }
  0x85   :  { %2216 = vmatpush3.bf16.msra.mxu0 %v2497_v33 }
  0x86   :  { %2217 = vmatprep.subr.bf16.mxu0 %v2499_v34 }
  0x89   :  { %2218 = vmatpush3.bf16.msra.mxu0 %v2500_v36 }
  0x8a   :  { %2219 = vmatprep.subr.bf16.mxu0 %v2502_v38 }
  0x8d   :  { %2220 = vmatpush3.bf16.msra.mxu0 %v2503_v39 }
  0x8e   :  { %2221 = vmatprep.subr.bf16.mxu0 %v2505_v41 }
  0x91   :  { %2222 = vmatpush3.bf16.msra.mxu0 %v2506_v42 }
  0x92   :  { %2251 = vmatprep.subr.bf16.mxu0 %v2509_v44 }
  0x94   :  { %1602 = vmatmul.mubr.bf16.vlgmr.msra.gmra.mrb[12].mxu0 %v2653_v32  ;;  %v2529_v32 = vld [vmem:[#allocation2 + $0x3a8] sm:$0xff]  }
  0x95   :  { %1683 = vmatprep.mubr.bf16.mxu0 %v2676_v4  ;;  %2252 = vmatpush3.bf16.msra.mxu0 %v2510_v45  ;;  %v2508_v45 = vld [vmem:[#allocation2 + $0x2c0] sm:$0xff]  }
  0x96   :  { %2253 = vmatprep.subr.bf16.mxu0 %v2513_v46 }
  0x99   :  { %2254 = vmatpush3.bf16.msra.mxu0 %v2514_v47  ;;  %v2511_v47 = vld [vmem:[#allocation2 + $0x308] sm:$0xff]  }
  0x9a   :  { %2255 = vmatprep.subr.bf16.mxu0 %v2517_v48  ;;  %v2512_v48 = vld [vmem:[#allocation2 + $0x2c8] sm:$0xff]  }
  0x9d   :  { %2256 = vmatpush3.bf16.msra.mxu0 %v2518_v49  ;;  %v2587_v49 = vld [vmem:[%s2805_s0 + $0xc] ss:$36 sps:$4 sm:$0xff]  }
  0x9e   :  { %2257 = vmatprep.subr.bf16.mxu0 %v2521_v50  ;;  %v2515_v50 = vld [vmem:[#allocation2 + $0x310] sm:$0xff]  }
  0xa1   :  { %2258 = vmatpush3.bf16.msra.mxu0 %v2522_v51  ;;  %v2516_v51 = vld [vmem:[#allocation2 + $0x2d0] sm:$0xff]  }
  0xa2   :  { %2259 = vmatprep.subr.bf16.mxu0 %v2525_v52  ;;  %v2519_v52 = vld [vmem:[#allocation2 + $0x318] sm:$0xff]  }
  0xa5   :  { %2260 = vmatpush3.bf16.msra.mxu0 %v2526_v53  ;;  %v2520_v53 = vld [vmem:[#allocation2 + $0x2d8] sm:$0xff]  }
  0xa6   :  { %2261 = vmatprep.subr.bf16.mxu0 %v2529_v32  ;;  %v2523_v32 = vld [vmem:[#allocation2 + $0x320] sm:$0xff]  }
  0xa9   :  { %2262 = vmatpush3.bf16.msra.mxu0 %v2530_v54  ;;  %v2524_v54 = vld [vmem:[#allocation2 + $0x2e0] sm:$0xff]  }
  0xaa   :  { %2263 = vmatprep.subr.bf16.mxu0 %v2533_v55  ;;  %v2527_v55 = vld [vmem:[#allocation2 + $0x328] sm:$0xff]  }
  0xad   :  { %2264 = vmatpush3.bf16.msra.mxu0 %v2534_v56  ;;  %v2528_v56 = vld [vmem:[#allocation2 + $0x2e8] sm:$0xff]  }
  0xae   :  { %2265 = vmatprep.subr.bf16.mxu0 %v2537_v57  ;;  %v2531_v57 = vld [vmem:[#allocation2 + $0x330] sm:$0xff]  }
  0xb1   :  { %2266 = vmatpush3.bf16.msra.mxu0 %v2538_v58  ;;  %v2532_v58 = vld [vmem:[#allocation2 + $0x2f0] sm:$0xff]  }
  0xb2   :  { %2353 = vmatprep.subr.bf16.mxu0 %v2616_v6 }
  0xb4   :  { %1684 = vmatmul.mubr.bf16.vlgmr.msra.gmra.mrb[16].mxu0 %v2671_v3  ;;  %v2556_v3 = vld [vmem:[#allocation2 + $0x468] sm:$0xff]  }
  0xb5   :  { %2354 = vmatpush3.bf16.msra.mxu0 %v2541_v59  ;;  %2369 = vmatprep.mubr.msk.bf16.mxu0 %vm2617_vm0, %v2616_v6  ;;  %v2535_v59 = vld [vmem:[#allocation2 + $0x338] sm:$0xff]  }
  0xb6   :  { %2355 = vmatprep.subr.bf16.mxu0 %v2616_v6 }
  0xb9   :  { %2356 = vmatpush3.bf16.msra.mxu0 %v2544_v60  ;;  %v2536_v60 = vld [vmem:[#allocation2 + $0x2f8] sm:$0xff]  }
  0xba   :  { %2357 = vmatprep.subr.bf16.mxu0 %v2616_v6 }
  0xbd   :  { %2358 = vmatpush3.bf16.msra.mxu0 %v2547_v61  ;;  %v2539_v61 = vld [vmem:[#allocation2 + $0x400] sm:$0xff]  }
  0xbe   :  { %2359 = vmatprep.subr.bf16.mxu0 %v2616_v6 }
  0xc1   :  { %2360 = vmatpush3.bf16.msra.mxu0 %v2550_v62  ;;  %v2540_v62 = vld [vmem:[#allocation2 + $0x3c0] sm:$0xff]  }
  0xc2   :  { %2361 = vmatprep.subr.bf16.mxu0 %v2616_v6 }
  0xc5   :  { %2362 = vmatpush3.bf16.msra.mxu0 %v2553_v63  ;;  %v2542_v63 = vld [vmem:[#allocation2 + $0x408] sm:$0xff]  }
  0xc6   :  { %2363 = vmatprep.subr.bf16.mxu0 %v2616_v6 }
  0xc9   :  { %2364 = vmatpush3.bf16.msra.mxu0 %v2556_v3  ;;  %v2546_v3 = vld [vmem:[#allocation2 + $0x3d0] sm:$0xff]  }
  0xca   :  { %2365 = vmatprep.subr.bf16.mxu0 %v2616_v6 }
  0xcd   :  { %2366 = vmatpush3.bf16.msra.mxu0 %v2559_v18 }
  0xce   :  { %2367 = vmatprep.subr.bf16.mxu0 %v2616_v6 }
  0xd1   :  { %2368 = vmatpush3.bf16.msra.mxu0 %v2562_v20 }
  0xd4   :  { %2370 = vmatmul.mubr.bf16.vlgmr.msra.gmra.mrb[20].mxu0 %v2708_v17 }
 0x107   :  { %v2117_v0 = vpop.f32.mrb[0].mxu0 }
 0x108   :  { %v2139_v1 = vpop.f32.mrb[0].mxu1  ;;  %v2118_v2 = vpop.f32.mrb[1].mxu0 }
 0x109   :  { %v2119_v4 = vadd.f32 %v2118_v2, %v2117_v0  ;;  %v2140_v5 = vpop.f32.mrb[1].mxu1  ;;  %v2120_v9 = vpop.f32.mrb[2].mxu0  ;;  %v2588_v0 = vld [vmem:[%s2805_s0 + $0x8] ss:$36 sps:$4 sm:$0xff]   ;;  %v2545_v2 = vld [vmem:[#allocation2 + $0x410] sm:$0xff]  }
 0x10a   :  { %v2141_v10 = vadd.f32 %v2140_v5, %v2139_v1  ;;  %v2142_v11 = vpop.f32.mrb[2].mxu1  ;;  %v2121_v12 = vpop.f32.mrb[3].mxu0  ;;  %v2543_v1 = vld [vmem:[#allocation2 + $0x3c8] sm:$0xff]   ;;  %v2549_v5 = vld [vmem:[#allocation2 + $0x3d8] sm:$0xff]  }
 0x10b   :  { %v2122_v13 = vadd.f32 %v2121_v12, %v2120_v9  ;;  %v2143_v14 = vpop.f32.mrb[3].mxu1  ;;  %v2551_v9 = vld [vmem:[#allocation2 + $0x420] sm:$0xff]   ;;  %v2555_v12 = vld [vmem:[#allocation2 + $0x3e8] sm:$0xff]  }
 0x10c   :  { %v737_v15 = vadd.f32 %v2141_v10, %v2119_v4  ;;  %v2144_v16 = vadd.f32 %v2143_v14, %v2142_v11  ;;  %v2548_v4 = vld [vmem:[#allocation2 + $0x418] sm:$0xff]   ;;  %v2552_v10 = vld [vmem:[#allocation2 + $0x3e0] sm:$0xff]   ;;  %v2554_v11 = vld [vmem:[#allocation2 + $0x428] sm:$0xff]  }
 0x10d   :  { %v2560_v14 = vld [vmem:[#allocation2 + $0x438] sm:$0xff]  }
 0x10e   :  { %v740_v19 = vadd.f32 %v2144_v16, %v2122_v13  ;;  %v2557_v13 = vld [vmem:[#allocation2 + $0x430] sm:$0xff]  }
 0x127   :  { %v2161_v21 = vpop.f32.mrb[4].mxu0 }
 0x128   :  { %v2162_v22 = vpop.f32.mrb[5].mxu0 }
 0x129   :  { %v2163_v23 = vadd.f32 %v2162_v22, %v2161_v21  ;;  %v2164_v24 = vpop.f32.mrb[6].mxu0  ;;  %v2183_v25 = vpop.f32.mrb[4].mxu1 }
 0x12a   :  { %v2165_v26 = vpop.f32.mrb[7].mxu0  ;;  %v2184_v29 = vpop.f32.mrb[5].mxu1 }
 0x12b   :  { %v778_v27 = vadd.f32 %v2163_v23, %v737_v15  ;;  %v2166_v28 = vadd.f32 %v2165_v26, %v2164_v24  ;;  %v2185_v30 = vadd.f32 %v2184_v29, %v2183_v25  ;;  %v2186_v31 = vpop.f32.mrb[6].mxu1  ;;  %v2561_v15 = vld [vmem:[#allocation2 + $0x3f8] sm:$0xff]   ;;  %v2563_v29 = vld [vmem:[%s2807_s2 + $0x40] sm:$0xff]  }
 0x12c   :  { %v2187_v34 = vpop.f32.mrb[7].mxu1 }
 0x12d   :  { %v781_v33 = vadd.f32 %v2166_v28, %v740_v19  ;;  %v2188_v35 = vadd.f32 %v2187_v34, %v2186_v31  ;;  %v819_v36 = vadd.f32 %v2185_v30, %v778_v27  ;;  %v2565_v30 = vld [vmem:[%s2807_s2 + $0x50] sm:$0xff]   ;;  %v2566_v31 = vld [vmem:[%s2807_s2 + $0x58] sm:$0xff]   ;;  %v2568_v34 = vld [vmem:[%s2807_s2 + $0x68] sm:$0xff]  }
 0x12f   :  { %v822_v37 = vadd.f32 %v2188_v35, %v781_v33  ;;  %v2567_v33 = vld [vmem:[%s2807_s2 + $0x60] sm:$0xff]  }
 0x147   :  { %v859_v38 = vpop.f32.mrb[8].mxu0 }
 0x148   :  { %v860_v39 = vadd.f32 %v859_v38, %v819_v36  ;;  %v2331_v40 = vpop.f32.mrb[9].mxu0 }
 0x149   :  { %v862_v17 = vpop.f32.mrb[10].mxu0  ;;  %v2570_v40 = vld [vmem:[%s2807_s2 + $0x78] sm:$0xff]  }
 0x14a   :  { %v863_v41 = vadd.f32 %v862_v17, %v822_v37  ;;  %v2332_v42 = vpop.f32.mrb[11].mxu0  ;;  %v866_v43 = vmax.f32 %v860_v39, 0.0  ;;  %v2569_v39 = vld [vmem:[%s2807_s2 + $0x70] sm:$0xff]  }
 0x14c   :  { %v867_v44 = vmax.f32 %v863_v41, 0.0 }
 0x14e   :  { %v868_v46 = vpack.c.bf16 %v867_v44, %v866_v43 }
 0x150   :  { %2350 = vmatmul.mubr.bf16.vlgmr.msra.gmra.mrb[8].mxu1 %v868_v46 }
 0x151   :  { %2230 = vmatpush3.bf16.msra.mxu1 %v2508_v45  ;;  %1642 = vmatprep.mubr.bf16.mxu1 %v2587_v49 }
 0x152   :  { %2231 = vmatprep.subr.bf16.mxu1 %v2511_v47 }
 0x155   :  { %2232 = vmatpush3.bf16.msra.mxu1 %v2512_v48 }
 0x156   :  { %2233 = vmatprep.subr.bf16.mxu1 %v2515_v50 }
 0x159   :  { %2234 = vmatpush3.bf16.msra.mxu1 %v2516_v51 }
 0x15a   :  { %2235 = vmatprep.subr.bf16.mxu1 %v2519_v52 }
 0x15d   :  { %2236 = vmatpush3.bf16.msra.mxu1 %v2520_v53 }
 0x15e   :  { %2237 = vmatprep.subr.bf16.mxu1 %v2523_v32 }
 0x161   :  { %2238 = vmatpush3.bf16.msra.mxu1 %v2524_v54 }
 0x162   :  { %2239 = vmatprep.subr.bf16.mxu1 %v2527_v55 }
 0x165   :  { %2240 = vmatpush3.bf16.msra.mxu1 %v2528_v56 }
 0x166   :  { %2241 = vmatprep.subr.bf16.mxu1 %v2531_v57 }
 0x167   :  { %v2223_v16 = vpop.f32.mrb[12].mxu0 }
 0x168   :  { %v2224_v18 = vpop.f32.mrb[13].mxu0 }
 0x169   :  { %2242 = vmatpush3.bf16.msra.mxu1 %v2532_v58  ;;  %v2225_v19 = vadd.f32 %v2224_v18, %v2223_v16  ;;  %v2226_v20 = vpop.f32.mrb[14].mxu0 }
 0x16a   :  { %2243 = vmatprep.subr.bf16.mxu1 %v2535_v59  ;;  %v2227_v21 = vpop.f32.mrb[15].mxu0 }
 0x16b   :  { %v2228_v22 = vadd.f32 %v2227_v21, %v2226_v20 }
 0x16d   :  { %2244 = vmatpush3.bf16.msra.mxu1 %v2536_v60 }
 0x16e   :  { %2273 = vmatprep.subr.bf16.mxu1 %v2539_v61 }
 0x170   :  { %1643 = vmatmul.mubr.bf16.vlgmr.msra.gmra.mrb[12].mxu1 %v2588_v0 }
 0x171   :  { %2274 = vmatpush3.bf16.msra.mxu1 %v2540_v62  ;;  %1724 = vmatprep.mubr.bf16.mxu1 %v2689_v8  ;;  %v2558_v8 = vld [vmem:[#allocation2 + $0x3f0] sm:$0xff]  }
 0x172   :  { %2275 = vmatprep.subr.bf16.mxu1 %v2542_v63 }
 0x175   :  { %2276 = vmatpush3.bf16.msra.mxu1 %v2543_v1 }
 0x176   :  { %2277 = vmatprep.subr.bf16.mxu1 %v2545_v2 }
 0x179   :  { %2278 = vmatpush3.bf16.msra.mxu1 %v2546_v3 }
 0x17a   :  { %2279 = vmatprep.subr.bf16.mxu1 %v2548_v4 }
 0x17d   :  { %2280 = vmatpush3.bf16.msra.mxu1 %v2549_v5 }
 0x17e   :  { %2281 = vmatprep.subr.bf16.mxu1 %v2551_v9 }
 0x181   :  { %2282 = vmatpush3.bf16.msra.mxu1 %v2552_v10 }
 0x182   :  { %2283 = vmatprep.subr.bf16.mxu1 %v2554_v11 }
 0x185   :  { %2284 = vmatpush3.bf16.msra.mxu1 %v2555_v12 }
 0x186   :  { %2285 = vmatprep.subr.bf16.mxu1 %v2557_v13 }
 0x187   :  { %v2267_v23 = vpop.f32.mrb[16].mxu0 }
 0x188   :  { %v2268_v24 = vpop.f32.mrb[17].mxu0 }
 0x189   :  { %2286 = vmatpush3.bf16.msra.mxu1 %v2558_v8  ;;  %v2269_v25 = vadd.f32 %v2268_v24, %v2267_v23  ;;  %v2270_v26 = vpop.f32.mrb[18].mxu0 }
 0x18a   :  { %2287 = vmatprep.subr.bf16.mxu1 %v2560_v14  ;;  %v2271_v27 = vpop.f32.mrb[19].mxu0 }
 0x18b   :  { %v2272_v28 = vadd.f32 %v2271_v27, %v2270_v26 }
 0x18d   :  { %2288 = vmatpush3.bf16.msra.mxu1 %v2561_v15 }
 0x18e   :  { %2373 = vmatprep.subr.bf16.mxu1 %v2616_v6 }
 0x190   :  { %1725 = vmatmul.mubr.bf16.vlgmr.msra.gmra.mrb[16].mxu1 %v2683_v7  ;;  %v2564_v7 = vld [vmem:[%s2807_s2 + $0x48] sm:$0xff]  }
 0x191   :  { %2389 = vmatprep.mubr.msk.bf16.mxu1 %vm2617_vm0, %v2616_v6  ;;  %2374 = vmatpush3.bf16.msra.mxu1 %v2563_v29 }
 0x192   :  { %2375 = vmatprep.subr.bf16.mxu1 %v2616_v6 }
 0x195   :  { %2376 = vmatpush3.bf16.msra.mxu1 %v2564_v7 }
 0x196   :  { %2377 = vmatprep.subr.bf16.mxu1 %v2616_v6 }
 0x199   :  { %2378 = vmatpush3.bf16.msra.mxu1 %v2565_v30 }
 0x19a   :  { %2379 = vmatprep.subr.bf16.mxu1 %v2616_v6 }
 0x19d   :  { %2380 = vmatpush3.bf16.msra.mxu1 %v2566_v31 }
 0x19e   :  { %2381 = vmatprep.subr.bf16.mxu1 %v2616_v6 }
 0x1a1   :  { %2382 = vmatpush3.bf16.msra.mxu1 %v2567_v33 }
 0x1a2   :  { %2383 = vmatprep.subr.bf16.mxu1 %v2616_v6 }
 0x1a5   :  { %2384 = vmatpush3.bf16.msra.mxu1 %v2568_v34 }
 0x1a6   :  { %2385 = vmatprep.subr.bf16.mxu1 %v2616_v6 }
 0x1a7   :  { %v1767_v35 = vpop.f32.mrb[20].mxu0 }
 0x1a8   :  { %v2371_v36 = vpop.f32.mrb[21].mxu0 }
 0x1a9   :  { %v1770_v37 = vpop.f32.mrb[22].mxu0  ;;  %2386 = vmatpush3.bf16.msra.mxu1 %v2569_v39 }
 0x1aa   :  { %v2372_v38 = vpop.f32.mrb[23].mxu0  ;;  %2387 = vmatprep.subr.bf16.mxu1 %v2616_v6 }
 0x1ad   :  { %2388 = vmatpush3.bf16.msra.mxu1 %v2570_v40 }
 0x223   :  { %v967_v17 = vpop.f32.mrb[8].mxu1 }
 0x224   :  { %974 = vmax.xlane.f32.xlu0 %v967_v17  ;;  %v2351_v41 = vpop.f32.mrb[9].mxu1 }
 0x225   :  { %v970_v42 = vpop.f32.mrb[10].mxu1 }
 0x226   :  { %v2352_v43 = vpop.f32.mrb[11].mxu1 }
 0x228   :  { %976 = vmax.xlane.f32.xlu0 %v970_v42 }
 0x243   :  { %v2245_v44 = vpop.f32.mrb[12].mxu1 }
 0x244   :  { %v2246_v45 = vpop.f32.mrb[13].mxu1 }
 0x245   :  { %v2247_v46 = vadd.f32 %v2246_v45, %v2245_v44  ;;  %v2248_v47 = vpop.f32.mrb[14].mxu1 }
 0x246   :  { %v2249_v48 = vpop.f32.mrb[15].mxu1 }
 0x247   :  { %v1645_v49 = vadd.f32 %v2247_v46, %v2225_v19  ;;  %v2250_v50 = vadd.f32 %v2249_v48, %v2248_v47 }
 0x249   :  { %v1648_v51 = vadd.f32 %v2250_v50, %v2228_v22  ;;  %v1686_v6 = vadd.f32 %v2269_v25, %v1645_v49 }
 0x24b   :  { %v1689_v52 = vadd.f32 %v2272_v28, %v1648_v51 }
 0x263   :  { %v2289_v53 = vpop.f32.mrb[16].mxu1 }
 0x264   :  { %v2290_v32 = vpop.f32.mrb[17].mxu1 }
 0x265   :  { %v2291_v54 = vadd.f32 %v2290_v32, %v2289_v53  ;;  %v2292_v55 = vpop.f32.mrb[18].mxu1 }
 0x266   :  { %v2293_v56 = vpop.f32.mrb[19].mxu1 }
 0x267   :  { %v1727_v57 = vadd.f32 %v2291_v54, %v1686_v6  ;;  %v2294_v58 = vadd.f32 %v2293_v56, %v2292_v55 }
 0x269   :  { %v1768_v59 = vadd.f32 %v1767_v35, %v1727_v57  ;;  %v1730_v60 = vadd.f32 %v2294_v58, %v1689_v52 }
 0x26b   :  { %v1771_v61 = vadd.f32 %v1770_v37, %v1730_v60  ;;  %v1774_v62 = vmax.f32 %v1768_v59, 0.0 }
 0x26d   :  { %v1775_v63 = vmax.f32 %v1771_v61, 0.0 }
 0x26f   :  { %v1776_v0 = vpack.c.bf16 %v1775_v63, %v1774_v62 }
 0x271   :  { %2390 = vmatmul.mubr.bf16.vlgmr.msra.gmra.mrb[20].mxu1 %v1776_v0 }
 0x2b1   :  { %v975_v1 = vpop.xlane.xlu0 %974 }
 0x2b2   :  { %v978_v2 = vsub.f32 %v967_v17, %v975_v1 }
 0x2b4   :  { %v980_v3 = vmul.f32 1.442695, %v978_v2 }
 0x2b5   :  { %v977_v5 = vpop.xlane.xlu0 %976 }
 0x2b6   :  { %2571 = vpow2.f32 %v980_v3  ;;  %v979_v9 = vsub.f32 %v970_v42, %v977_v5 }
 0x2b8   :  { %v982_v10 = vmul.f32 1.442695, %v979_v9 }
 0x2ba   :  { %2573 = vpow2.f32 %v982_v10 }
 0x2c0   :  { %v2572_v4 = vpop.eup %2571 }
 0x2c1   :  { %984 = vadd.xlane.f32.xlu0 %v2572_v4 }
 0x2c4   :  { %v2574_v14 = vpop.eup %2573 }
 0x344   :  { %v1876_v11 = vpop.f32.mrb[20].mxu1 }
 0x345   :  { %1883 = vmax.xlane.f32.xlu1 %v1876_v11  ;;  %v2391_v12 = vpop.f32.mrb[21].mxu1 }
 0x346   :  { %v1879_v13 = vpop.f32.mrb[22].mxu1 }
 0x347   :  { %v2392_v8 = vpop.f32.mrb[23].mxu1 }
 0x349   :  { %1885 = vmax.xlane.f32.xlu1 %v1879_v13 }
 0x34d   :  { %986 = vadd.xlane.f32.xlu1 %v2574_v14 }
 0x34e   :  { %v985_v24 = vpop.xlane.xlu0 %984 }
 0x3d2   :  { %v1884_v15 = vpop.xlane.xlu1 %1883 }
 0x3d3   :  { %v1887_v16 = vsub.f32 %v1876_v11, %v1884_v15 }
 0x3d5   :  { %v1889_v18 = vmul.f32 1.442695, %v1887_v16 }
 0x3d6   :  { %v1886_v19 = vpop.xlane.xlu1 %1885 }
 0x3d7   :  { %2575 = vpow2.f32 %v1889_v18  ;;  %v1888_v20 = vsub.f32 %v1879_v13, %v1886_v19 }
 0x3d9   :  { %v1891_v21 = vmul.f32 1.442695, %v1888_v20 }
 0x3da   :  { %v987_v25 = vpop.xlane.xlu1 %986 }
 0x3db   :  { %2577 = vpow2.f32 %v1891_v21 }
 0x3dc   :  { %2579 = vrcp.f32 %v985_v24 }
 0x3e1   :  { %v2576_v22 = vpop.eup %2575 }
 0x3e2   :  { %1893 = vadd.xlane.f32.xlu0 %v2576_v22 }
 0x3e5   :  { %v2578_v23 = vpop.eup %2577 }
 0x3e6   :  { %1895 = vadd.xlane.f32.xlu1 %v2578_v23  ;;  %v2580_v28 = vpop.eup %2579 }
 0x3e7   :  { %v990_v7 = vmul.f32 %v2580_v28, %v2572_v4 }
 0x46f   :  { %v1894_v26 = vpop.xlane.xlu0 %1893 }
 0x470   :  { %2581 = vrcp.f32 %v1894_v26  ;;  %vm1901_vm1 = vcmp.lt.f32.partialorder %v1894_v26, %v985_v24 }
 0x471   :  { %2583 = vrcp.f32 %v987_v25 }
 0x473   :  { %v1896_v27 = vpop.xlane.xlu1 %1895 }
 0x474   :  { %2585 = vrcp.f32 %v1896_v27  ;;  %vm1902_vm2 = vcmp.lt.f32.partialorder %v1896_v27, %v987_v25 }
 0x47a   :  { %v2582_v29 = vpop.eup %2581 }
 0x47b   :  { %v1899_v30 = vmul.f32 %v2582_v29, %v2576_v22  ;;  %v2584_v31 = vpop.eup %2583 }
 0x47c   :  { %v991_v35 = vmul.f32 %v2584_v31, %v2574_v14 }
 0x47d   :  { %v1907_v33 = vsel %vm1901_vm1, %v1899_v30, %v990_v7 }
 0x47e   :  { %v2586_v34 = vpop.eup %2585  ;;  %1909 = vst [vmem:[%s2808_s3] sm:$0xff] %v1907_v33 }
 0x47f   :  { %v1900_v36 = vmul.f32 %v2586_v34, %v2578_v23 }
 0x481   :  { %v1908_v37 = vsel %vm1902_vm2, %v1900_v36, %v991_v35 }
 0x482   :  { %1910 = vst [vmem:[%s2808_s3 + $0x8] sm:$0xff] %v1908_v37 }
 0x483   :  { %1915 = vsyncpa [#allocation3], 1 }

</bundles_post_ra>
